<compile_context>
chip_gen: v6e
topology: v6e:2x2x1
jax: 0.10.0
libtpu: 0.0.40
codegen_flags: <defaults>
</compile_context>

<pallas_src>
import functools

import jax
import jax.numpy as jnp
from jax import lax
from jax.experimental import pallas as pl
from jax.experimental.pallas import tpu as pltpu

D_IN, D_H1, D_H2, D_OUT = 19, 64, 32, 1


def _round_up(n, m):
    return ((n + m - 1) // m) * m


def _mlp_kernel(x_ref, w1_ref, b1_ref, w2_ref, b2_ref, w3_ref, b3_ref, o_ref,
                *, use_bf16):
    x = x_ref[...]        # (tb, 19)  batch on sublanes (as stored in HBM)
    w1 = w1_ref[...]      # (64, 19)
    w2 = w2_ref[...]      # (32, 64)
    if use_bf16:
        x = x.astype(jnp.bfloat16)
        w1 = w1.astype(jnp.bfloat16)
        w2 = w2.astype(jnp.bfloat16)

    # Layer 1: contract the 19-dim directly on the MXU (w1 @ x^T) -> (64, tb).
    h1 = lax.dot_general(w1, x, (((1,), (1,)), ((), ())),
                         preferred_element_type=jnp.float32)
    h1 = jnp.maximum(h1 + b1_ref[...], 0.0)                     # (64, tb) f32

    # Layer 2: (32, 64) @ (64, tb) on the MXU.
    h1m = h1.astype(jnp.bfloat16) if use_bf16 else h1
    h2 = jnp.dot(w2, h1m, preferred_element_type=jnp.float32)
    h2 = jnp.maximum(h2 + b2_ref[...], 0.0)                     # (32, tb) f32

    # Layer 3 (32 -> 1): keep it off the MXU — VPU multiply + sublane reduce.
    h3 = jnp.sum(h2 * w3_ref[...], axis=0, keepdims=True)       # (1, tb)
    o_ref[...] = jnp.tanh(h3 + b3_ref[...]).astype(o_ref.dtype)  # EUP tanh


def _choose_batch_tile(B):
    """Rows per grid step (always a multiple of the 128-lane width)."""
    b128 = _round_up(max(B, 1), 128)
    if b128 <= 2048:
        # Single step: nothing to hide behind the ~0.35us per-step overhead,
        # and single-TC chips (v5e/v6e) gain nothing from splitting.
        return b128
    # Large batch: >= 4 steps total (>= 2 per core on a 2-TC v7x) so BlockSpec
    # double-buffering overlaps the x DMA with compute on every core; cap at
    # 16384 rows (~10 MiB of VMEM incl. h1/h2 temporaries -> fits all chips).
    tb = _round_up(pl.cdiv(b128, 4), 128)
    return max(128, min(16384, tb))


def trading_model19_forward(x, params, *, batch_tile=None, use_bf16=False):
    """Fused MLP forward pass.

    x: [B, 19] float32
    params: dict with w1 (64,19), b1 (64,1), w2 (32,64), b2 (32,1),
            w3 (32,1) (== fc3.weight.T), b3 (1,1)
    returns: [B, 1] float32
    """
    B = x.shape[0]
    assert x.shape[1] == D_IN

    tb = _choose_batch_tile(B) if batch_tile is None else batch_tile
    assert tb % 128 == 0, "batch tile must be a multiple of the 128-lane width"
    grid = (pl.cdiv(B, tb),)   # ragged edge block handled by Pallas masking

    w1, b1 = params["w1"], params["b1"]
    w2, b2 = params["w2"], params["b2"]
    w3, b3 = params["w3"], params["b3"]

    # Weights/biases are tiny (~22 KB total): full-extent blocks with constant
    # index_maps stay resident in VMEM across all grid steps.
    full = lambda shape: pl.BlockSpec(shape, lambda i: (0, 0))

    cost = pl.CostEstimate(
        flops=2 * B * (D_IN * D_H1 + D_H1 * D_H2 + D_H2 * D_OUT),
        transcendentals=B,  # tanh
        bytes_accessed=4 * (B * (D_IN + D_OUT)
                            + D_IN * D_H1 + D_H1
                            + D_H1 * D_H2 + D_H2
                            + D_H2 * D_OUT + D_OUT),
    )

    outT = pl.pallas_call(
        functools.partial(_mlp_kernel, use_bf16=use_bf16),
        out_shape=jax.ShapeDtypeStruct((D_OUT, B), jnp.float32),
        grid_spec=pltpu.PrefetchScalarGridSpec(
            num_scalar_prefetch=0,
            grid=grid,
            in_specs=[
                pl.BlockSpec((tb, D_IN), lambda i: (i, 0)),   # x tile, no copy
                full(w1.shape), full(b1.shape),
                full(w2.shape), full(b2.shape),
                full(w3.shape), full(b3.shape),
            ],
            out_specs=pl.BlockSpec((D_OUT, tb), lambda i: (0, i)),  # lane-dense
        ),
        compiler_params=pltpu.CompilerParams(
            dimension_semantics=("parallel",),   # megacore sharding of steps
            vmem_limit_bytes=32 << 20,           # large-tile path fits v5e too
        ),
        cost_estimate=cost,
    )(x, w1, b1, w2, b2, w3, b3)

    # (1, B) -> (B, 1) is a free row-major reshape; no padded rows to drop.
    return outT.reshape(B, D_OUT)


def init_params(key):
    """Deterministic init matching PyTorch Linear shapes.

    Stored as: w (out, in) like torch, biases as (out, 1) columns,
    fc3 weight as a (32, 1) column (== fc3.weight.T).
    """
    k1, k2, k3, k4, k5, k6 = jax.random.split(key, 6)

    def uniform(k, shape, fan_in):
        bound = 1.0 / jnp.sqrt(fan_in)
        return jax.random.uniform(k, shape, jnp.float32, -bound, bound)

    return {
        "w1": uniform(k1, (D_H1, D_IN), D_IN),
        "b1": uniform(k2, (D_H1, 1), D_IN),
        "w2": uniform(k3, (D_H2, D_H1), D_H1),
        "b2": uniform(k4, (D_H2, 1), D_H1),
        "w3": uniform(k5, (D_H2, D_OUT), D_H2),
        "b3": uniform(k6, (D_OUT, 1), D_H2),
    }


def reference_forward(x, p):
    h1 = jnp.maximum(x @ p["w1"].T + p["b1"].T, 0.0)
    h2 = jnp.maximum(h1 @ p["w2"].T + p["b2"].T, 0.0)
    h3 = jnp.sum(h2 * p["w3"][:, 0], axis=-1, keepdims=True) + p["b3"][0, 0]
    return jnp.tanh(h3)


if __name__ == "__main__":
    key = jax.random.PRNGKey(0)
    kx, kp = jax.random.split(key)

    B = 300  # deliberately ragged: exercises the masked edge block (no pad)
    x = jax.random.normal(kx, (B, D_IN), jnp.float32)
    params = init_params(kp)

    out = trading_model19_forward(x, params)          # f32 path (bit-matches ref)
    out = jax.block_until_ready(out)

    ref = reference_forward(x, params)
    assert out.shape == (B, D_OUT)
    assert jnp.allclose(out, ref, atol=5e-5, rtol=5e-5), "mismatch vs reference"

    # Optional bf16-matmul path (looser tolerance; exercised for coverage).
    out_bf16 = jax.block_until_ready(
        trading_model19_forward(x, params, use_bf16=True))
    assert jnp.allclose(out_bf16, ref, atol=2e-2, rtol=2e-2), "bf16 mismatch"

    print("KERNEL_OK")
</pallas_src>

<mosaic_0001>
module attributes {stable_mosaic.version = 11 : i64} {
  func.func @_mlp_kernel(%arg0: i32, %arg1: memref<384x19xf32, #tpu.memory_space<vmem>>, %arg2: memref<64x19xf32, #tpu.memory_space<vmem>>, %arg3: memref<64x1xf32, #tpu.memory_space<vmem>>, %arg4: memref<32x64xf32, #tpu.memory_space<vmem>>, %arg5: memref<32x1xf32, #tpu.memory_space<vmem>>, %arg6: memref<32x1xf32, #tpu.memory_space<vmem>>, %arg7: memref<1x1xf32, #tpu.memory_space<vmem>>, %arg8: memref<1x384xf32, #tpu.memory_space<vmem>>) attributes {dimension_semantics = [#tpu.dimension_semantics<parallel>], iteration_bounds = array<i64: 1>, scalar_prefetch = 0 : i64, scratch_operands = 0 : i64, tpu.core_type = #tpu.core_type<tc>, window_params = [{transform_indices = @transform_0, window_bounds = array<i64: 384, 19>}, {pipeline_mode = #tpu.pipeline_mode<synchronous>, transform_indices = @transform_1, window_bounds = array<i64: 64, 19>}, {pipeline_mode = #tpu.pipeline_mode<synchronous>, transform_indices = @transform_2, window_bounds = array<i64: 64, 1>}, {pipeline_mode = #tpu.pipeline_mode<synchronous>, transform_indices = @transform_3, window_bounds = array<i64: 32, 64>}, {pipeline_mode = #tpu.pipeline_mode<synchronous>, transform_indices = @transform_4, window_bounds = array<i64: 32, 1>}, {pipeline_mode = #tpu.pipeline_mode<synchronous>, transform_indices = @transform_5, window_bounds = array<i64: 32, 1>}, {pipeline_mode = #tpu.pipeline_mode<synchronous>, transform_indices = @transform_6, window_bounds = array<i64: 1, 1>}, {transform_indices = @transform_7, window_bounds = array<i64: 1, 384>}]} {
    %c0 = arith.constant 0 : index
    %c0_0 = arith.constant 0 : index
    %0 = vector.load %arg1[%c0, %c0_0] : memref<384x19xf32, #tpu.memory_space<vmem>>, vector<384x19xf32>
    %c0_1 = arith.constant 0 : index
    %c0_2 = arith.constant 0 : index
    %1 = vector.load %arg2[%c0_1, %c0_2] : memref<64x19xf32, #tpu.memory_space<vmem>>, vector<64x19xf32>
    %c0_3 = arith.constant 0 : index
    %c0_4 = arith.constant 0 : index
    %2 = vector.load %arg4[%c0_3, %c0_4] : memref<32x64xf32, #tpu.memory_space<vmem>>, vector<32x64xf32>
    %cst = arith.constant dense<0.000000e+00> : vector<64x384xf32>
    %3 = tpu.matmul %1, %0, %cst {dimension_numbers = #tpu.dot_dimension_numbers<[1], [1], [0], [0], [0, 0, 1, 0], [], []>} : vector<64x19xf32>, vector<384x19xf32>, vector<64x384xf32> -> vector<64x384xf32>
    %c0_5 = arith.constant 0 : index
    %c0_6 = arith.constant 0 : index
    %4 = vector.load %arg3[%c0_5, %c0_6] : memref<64x1xf32, #tpu.memory_space<vmem>>, vector<64x1xf32>
    %5 = vector.broadcast %4 : vector<64x1xf32> to vector<64x384xf32>
    %6 = arith.addf %3, %5 : vector<64x384xf32>
    %cst_7 = arith.constant 0.000000e+00 : f32
    %7 = vector.broadcast %cst_7 : f32 to vector<64x384xf32>
    %8 = arith.maximumf %6, %7 : vector<64x384xf32>
    %cst_8 = arith.constant dense<0.000000e+00> : vector<32x384xf32>
    %9 = tpu.matmul %2, %8, %cst_8 {dimension_numbers = #tpu.dot_dimension_numbers<[1], [0], [0], [1], [0, 0, 1, 1], [], []>} : vector<32x64xf32>, vector<64x384xf32>, vector<32x384xf32> -> vector<32x384xf32>
    %c0_9 = arith.constant 0 : index
    %c0_10 = arith.constant 0 : index
    %10 = vector.load %arg5[%c0_9, %c0_10] : memref<32x1xf32, #tpu.memory_space<vmem>>, vector<32x1xf32>
    %11 = vector.broadcast %10 : vector<32x1xf32> to vector<32x384xf32>
    %12 = arith.addf %9, %11 : vector<32x384xf32>
    %cst_11 = arith.constant 0.000000e+00 : f32
    %13 = vector.broadcast %cst_11 : f32 to vector<32x384xf32>
    %14 = arith.maximumf %12, %13 : vector<32x384xf32>
    %c0_12 = arith.constant 0 : index
    %c0_13 = arith.constant 0 : index
    %15 = vector.load %arg6[%c0_12, %c0_13] : memref<32x1xf32, #tpu.memory_space<vmem>>, vector<32x1xf32>
    %16 = vector.broadcast %15 : vector<32x1xf32> to vector<32x384xf32>
    %17 = arith.mulf %14, %16 : vector<32x384xf32>
    %cst_14 = arith.constant dense<0.000000e+00> : vector<384xf32>
    %18 = vector.multi_reduction <add>, %17, %cst_14 [0] : vector<32x384xf32> to vector<384xf32>
    %19 = vector.shape_cast %18 : vector<384xf32> to vector<1x384xf32>
    %c0_15 = arith.constant 0 : index
    %c0_16 = arith.constant 0 : index
    %20 = vector.load %arg7[%c0_15, %c0_16] : memref<1x1xf32, #tpu.memory_space<vmem>>, vector<1x1xf32>
    %21 = vector.broadcast %20 : vector<1x1xf32> to vector<1x384xf32>
    %22 = arith.addf %19, %21 : vector<1x384xf32>
    %23 = math.tanh %22 : vector<1x384xf32>
    %c0_17 = arith.constant 0 : index
    %c0_18 = arith.constant 0 : index
    %24 = vector.load %arg8[%c0_17, %c0_18] : memref<1x384xf32, #tpu.memory_space<vmem>>, vector<1x384xf32>
    tpu.vector_store %arg8[%c0_17, %c0_18], %23 {strides = array<i32>} : memref<1x384xf32, #tpu.memory_space<vmem>>, vector<1x384xf32>,
    return
  }
  func.func @transform_0(%arg0: i32) -> (i32, i32) {
    %c0_i32 = arith.constant 0 : i32
    %c0_i32_0 = arith.constant 0 : i32
    return %arg0, %c0_i32 : i32, i32
  }
  func.func @transform_1(%arg0: i32) -> (i32, i32) {
    %c0_i32 = arith.constant 0 : i32
    %c0_i32_0 = arith.constant 0 : i32
    %c0_i32_1 = arith.constant 0 : i32
    return %c0_i32, %c0_i32_0 : i32, i32
  }
  func.func @transform_2(%arg0: i32) -> (i32, i32) {
    %c0_i32 = arith.constant 0 : i32
    %c0_i32_0 = arith.constant 0 : i32
    %c0_i32_1 = arith.constant 0 : i32
    return %c0_i32, %c0_i32_0 : i32, i32
  }
  func.func @transform_3(%arg0: i32) -> (i32, i32) {
    %c0_i32 = arith.constant 0 : i32
    %c0_i32_0 = arith.constant 0 : i32
    %c0_i32_1 = arith.constant 0 : i32
    return %c0_i32, %c0_i32_0 : i32, i32
  }
  func.func @transform_4(%arg0: i32) -> (i32, i32) {
    %c0_i32 = arith.constant 0 : i32
    %c0_i32_0 = arith.constant 0 : i32
    %c0_i32_1 = arith.constant 0 : i32
    return %c0_i32, %c0_i32_0 : i32, i32
  }
  func.func @transform_5(%arg0: i32) -> (i32, i32) {
    %c0_i32 = arith.constant 0 : i32
    %c0_i32_0 = arith.constant 0 : i32
    %c0_i32_1 = arith.constant 0 : i32
    return %c0_i32, %c0_i32_0 : i32, i32
  }
  func.func @transform_6(%arg0: i32) -> (i32, i32) {
    %c0_i32 = arith.constant 0 : i32
    %c0_i32_0 = arith.constant 0 : i32
    %c0_i32_1 = arith.constant 0 : i32
    return %c0_i32, %c0_i32_0 : i32, i32
  }
  func.func @transform_7(%arg0: i32) -> (i32, i32) {
    %c0_i32 = arith.constant 0 : i32
    %c0_i32_0 = arith.constant 0 : i32
    return %c0_i32, %arg0 : i32, i32
  }
}

</mosaic_0001>

<bundles_post_ra>
// kernel: tpu_custom_call.1
= control target key start
LH: loop header
LB: loop body
LE: loop exit
PB: predicated region body
PF: predicated region fallthrough
CT: control target
= control target key end

     0   :  { %s1649_s0 = inlined_call_operand.vmem [shape: f32[300,19], index: 0, kind: input, shape index: {}]   ;;  %s1650_s1 = inlined_call_operand.vmem [shape: f32[64,19], index: 1, kind: input, shape index: {}]   ;;  %s1651_s2 = inlined_call_operand.vmem [shape: f32[64,1], index: 2, kind: input, shape index: {}]   ;;  %s1652_s3 = inlined_call_operand.vmem [shape: f32[32,64], index: 3, kind: input, shape index: {}]   ;;  %s1653_s4 = inlined_call_operand.vmem [shape: f32[32,1], index: 4, kind: input, shape index: {}]   ;;  %s1654_s5 = inlined_call_operand.vmem [shape: f32[32,1], index: 5, kind: input, shape index: {}]   ;;  %s1655_s6 = inlined_call_operand.<no memory space> [shape: f32[1,1], index: 6, kind: input, shape index: {}]   ;;  %s1656_s7 = inlined_call_operand.hbm [shape: f32[1,300], index: 7, kind: output, shape index: {}]  }
   0x1   :  { %v12_v0 = vstv %s1655_s6 }
   0x2   :  { %13 = vst [vmem:[#allocation2] sm:$0x1] %v12_v0 }
   0x3   :  { %v60_v1 = vld [vmem:[%s1649_s0 + $0xf8] sm:$0xff]  ;;  %vm137_vm0 = vcmask 154624   ;;  %v59_v4 = vld [vmem:[%s1649_s0 + $0xf0] sm:$0xff]  ;;  %v58_v7 = vld [vmem:[%s1649_s0 + $0xe8] sm:$0xff]  ;;  %v1168_v9 = vmov 0  }
   0x4   :  { %v76_v2 = vld [vmem:[%s1649_s0 + $0x178] sm:$0xff]  ;;  %968 = vmatprep.subr.msk.mxu0 %vm137_vm0, %v60_v1  ;;  %v75_v5 = vld [vmem:[%s1649_s0 + $0x170] sm:$0xff]  ;;  %v74_v8 = vld [vmem:[%s1649_s0 + $0x168] sm:$0xff]  ;;  %1139 = vset.pattern.permute.xlu1 %v1168_v9 }
   0x5   :  { %v44_v3 = vld [vmem:[%s1649_s0 + $0x78] sm:$0xff]  ;;  %1052 = vmatprep.subr.msk.mxu1 %vm137_vm0, %v76_v2  ;;  %v43_v6 = vld [vmem:[%s1649_s0 + $0x70] sm:$0xff]  ;;  %1138 = vset.pattern.permute.xlu0 %v1168_v9  ;;  %v42_v10 = vld [vmem:[%s1649_s0 + $0x68] sm:$0xff] }
   0x6   :  { %969 = vmatpush3.xpose.msk.msra.mxu0 %vm137_vm0, %v44_v3  ;;  %1053 = vmatpush3.xpose.msk.msra.mxu1 %vm137_vm0, %v76_v2  ;;  %v57_v11 = vld [vmem:[%s1649_s0 + $0xe0] sm:$0xff]  ;;  %v56_v14 = vld [vmem:[%s1649_s0 + $0xd8] sm:$0xff]  ;;  %v55_v17 = vld [vmem:[%s1649_s0 + $0xd0] sm:$0xff] }
   0x7   :  { %970 = vmatprep.subr.msk.mxu0 %vm137_vm0, %v59_v4  ;;  %1054 = vmatprep.subr.msk.mxu1 %vm137_vm0, %v75_v5  ;;  %v73_v12 = vld [vmem:[%s1649_s0 + $0x160] sm:$0xff]  ;;  %v72_v15 = vld [vmem:[%s1649_s0 + $0x158] sm:$0xff]  ;;  %v71_v18 = vld [vmem:[%s1649_s0 + $0x150] sm:$0xff] }
   0x8   :  { %v41_v13 = vld [vmem:[%s1649_s0 + $0x60] sm:$0xff]  ;;  %v40_v16 = vld [vmem:[%s1649_s0 + $0x58] sm:$0xff]  ;;  %v94_v20 = vld [vmem:[%s1651_s2 + $0x28] sm:$0xff] }
   0x9   :  { %v1287_v19 = vld [vmem:[%s1650_s1] sm:$0xff]  ;;  %v39_v21 = vld [vmem:[%s1649_s0 + $0x50] sm:$0xff]  ;;  %v96_v22 = vld [vmem:[%s1651_s2 + $0x38] sm:$0xff]  ;;  %124 = vperm.xlu1 %1139, %v94_v20  }
   0xa   :  { %971 = vmatpush3.xpose.msk.msra.mxu0 %vm137_vm0, %v43_v6  ;;  %1055 = vmatpush3.xpose.msk.msra.mxu1 %vm137_vm0, %v75_v5  ;;  %v54_v23 = vld [vmem:[%s1649_s0 + $0xc8] sm:$0xff]  ;;  %v93_v25 = vld [vmem:[%s1651_s2 + $0x20] sm:$0xff]  ;;  %v95_v26 = vld [vmem:[%s1651_s2 + $0x30] sm:$0xff] }
   0xb   :  { %972 = vmatprep.subr.msk.mxu0 %vm137_vm0, %v58_v7  ;;  %1056 = vmatprep.subr.msk.mxu1 %vm137_vm0, %v74_v8  ;;  %v70_v24 = vld [vmem:[%s1649_s0 + $0x148] sm:$0xff]  ;;  %v53_v28 = vld [vmem:[%s1649_s0 + $0xc0] sm:$0xff] }
   0xc   :  { %1000 = vmatprep.mubr.msk.f32.mxu0 %vm137_vm0, %v1287_v19  ;;  %1084 = vmatprep.mubr.msk.f32.mxu1 %vm137_vm0, %v1287_v19  ;;  %v38_v27 = vld [vmem:[%s1649_s0 + $0x48] sm:$0xff]  ;;  %v69_v29 = vld [vmem:[%s1649_s0 + $0x140] sm:$0xff] }
   0xd   :  { %134 = vperm.xlu0 %1138, %v96_v22   ;;  %119 = vperm.xlu1 %1139, %v93_v25  }
   0xe   :  { %973 = vmatpush3.xpose.msk.msra.mxu0 %vm137_vm0, %v42_v10  ;;  %1057 = vmatpush3.xpose.msk.msra.mxu1 %vm137_vm0, %v74_v8 }
   0xf   :  { %974 = vmatprep.subr.msk.mxu0 %vm137_vm0, %v57_v11  ;;  %1058 = vmatprep.subr.msk.mxu1 %vm137_vm0, %v73_v12 }
  0x11   :  { %129 = vperm.xlu0 %1138, %v95_v26  }
  0x12   :  { %975 = vmatpush3.xpose.msk.msra.mxu0 %vm137_vm0, %v41_v13  ;;  %1059 = vmatpush3.xpose.msk.msra.mxu1 %vm137_vm0, %v73_v12 }
  0x13   :  { %976 = vmatprep.subr.msk.mxu0 %vm137_vm0, %v56_v14  ;;  %1060 = vmatprep.subr.msk.mxu1 %vm137_vm0, %v72_v15 }
  0x16   :  { %977 = vmatpush3.xpose.msk.msra.mxu0 %vm137_vm0, %v40_v16  ;;  %1061 = vmatpush3.xpose.msk.msra.mxu1 %vm137_vm0, %v72_v15 }
  0x17   :  { %978 = vmatprep.subr.msk.mxu0 %vm137_vm0, %v55_v17  ;;  %1062 = vmatprep.subr.msk.mxu1 %vm137_vm0, %v71_v18 }
  0x1a   :  { %979 = vmatpush3.xpose.msk.msra.mxu0 %vm137_vm0, %v39_v21  ;;  %1063 = vmatpush3.xpose.msk.msra.mxu1 %vm137_vm0, %v71_v18 }
  0x1b   :  { %980 = vmatprep.subr.msk.mxu0 %vm137_vm0, %v54_v23  ;;  %1064 = vmatprep.subr.msk.mxu1 %vm137_vm0, %v70_v24 }
  0x1c   :  { %14 = vsyncpa [#allocation4], 0  ;;  %v91_v30 = vld [vmem:[%s1651_s2 + $0x10] sm:$0xff]  ;;  %v92_v31 = vld [vmem:[%s1651_s2 + $0x18] sm:$0xff]  ;;  %vm572_vm1 = vcmask 523264   ;;  %v1169_v12 = vmov 0.0  }
  0x1d   :  { %v37_v32 = vld [vmem:[%s1649_s0 + $0x40] sm:$0xff]  ;;  %v52_v33 = vld [vmem:[%s1649_s0 + $0xb8] sm:$0xff]  ;;  %109 = vperm.xlu1 %1139, %v91_v30   ;;  %114 = vperm.xlu0 %1138, %v92_v31   ;;  %v90_v36 = vld [vmem:[%s1651_s2 + $0x8] sm:$0xff] }
  0x1e   :  { %981 = vmatpush3.xpose.msk.msra.mxu0 %vm137_vm0, %v38_v27  ;;  %1065 = vmatpush3.xpose.msk.msra.mxu1 %vm137_vm0, %v70_v24  ;;  %v68_v34 = vld [vmem:[%s1649_s0 + $0x138] sm:$0xff]  ;;  %v89_v35 = vld [vmem:[%s1651_s2] sm:$0xff]  ;;  %v51_v38 = vld [vmem:[%s1649_s0 + $0xb0] sm:$0xff] }
  0x1f   :  { %982 = vmatprep.subr.msk.mxu0 %vm137_vm0, %v53_v28  ;;  %1066 = vmatprep.subr.msk.mxu1 %vm137_vm0, %v69_v29  ;;  %v36_v37 = vld [vmem:[%s1649_s0 + $0x38] sm:$0xff]  ;;  %v67_v39 = vld [vmem:[%s1649_s0 + $0x130] sm:$0xff]  ;;  %v548_v40 = vld [vmem:[%s1653_s4] sm:$0xff] }
  0x20   :  { %v549_v41 = vld [vmem:[%s1653_s4 + $0x8] sm:$0xff]  ;;  %v35_v42 = vld [vmem:[%s1649_s0 + $0x30] sm:$0xff]  ;;  %v551_v46 = vld [vmem:[%s1653_s4 + $0x18] sm:$0xff] }
  0x21   :  { %99 = vperm.xlu1 %1139, %v89_v35   ;;  %104 = vperm.xlu0 %1138, %v90_v36   ;;  %v50_v43 = vld [vmem:[%s1649_s0 + $0xa8] sm:$0xff]  ;;  %v550_v45 = vld [vmem:[%s1653_s4 + $0x10] sm:$0xff]  ;;  %v49_v48 = vld [vmem:[%s1649_s0 + $0xa0] sm:$0xff] }
  0x22   :  { %983 = vmatpush3.xpose.msk.msra.mxu0 %vm137_vm0, %v37_v32  ;;  %1067 = vmatpush3.xpose.msk.msra.mxu1 %vm137_vm0, %v69_v29  ;;  %v66_v44 = vld [vmem:[%s1649_s0 + $0x128] sm:$0xff]  ;;  %v65_v49 = vld [vmem:[%s1649_s0 + $0x120] sm:$0xff]  ;;  %v48_v53 = vld [vmem:[%s1649_s0 + $0x98] sm:$0xff] }
  0x23   :  { %984 = vmatprep.subr.msk.mxu0 %vm137_vm0, %v52_v33  ;;  %1068 = vmatprep.subr.msk.mxu1 %vm137_vm0, %v68_v34  ;;  %v34_v47 = vld [vmem:[%s1649_s0 + $0x28] sm:$0xff]  ;;  %v771_v50 = vld [vmem:[%s1654_s5] sm:$0xff]  ;;  %v64_v54 = vld [vmem:[%s1649_s0 + $0x118] sm:$0xff] }
  0x24   :  { %v772_v51 = vld [vmem:[%s1654_s5 + $0x8] sm:$0xff]  ;;  %v33_v52 = vld [vmem:[%s1649_s0 + $0x20] sm:$0xff]  ;;  %v773_v55 = vld [vmem:[%s1654_s5 + $0x10] sm:$0xff] }
  0x25   :  { %554 = vperm.xlu0 %1138, %v548_v40   ;;  %559 = vperm.xlu1 %1139, %v549_v41   ;;  %v774_v56 = vld [vmem:[%s1654_s5 + $0x18] sm:$0xff]  ;;  %v47_v58 = vld [vmem:[%s1649_s0 + $0x90] sm:$0xff]  ;;  %v834_v60 = vld [vmem:[#allocation2] sm:$0x1] }
  0x26   :  { %985 = vmatpush3.xpose.msk.msra.mxu0 %vm137_vm0, %v36_v37  ;;  %1069 = vmatpush3.xpose.msk.msra.mxu1 %vm137_vm0, %v68_v34  ;;  %v32_v57 = vld [vmem:[%s1649_s0 + $0x18] sm:$0xff]  ;;  %v63_v59 = vld [vmem:[%s1649_s0 + $0x110] sm:$0xff]  ;;  %v46_v62 = vld [vmem:[%s1649_s0 + $0x88] sm:$0xff] }
  0x27   :  { %986 = vmatprep.subr.msk.mxu0 %vm137_vm0, %v51_v38  ;;  %1070 = vmatprep.subr.msk.mxu1 %vm137_vm0, %v67_v39  ;;  %v31_v61 = vld [vmem:[%s1649_s0 + $0x10] sm:$0xff]  ;;  %v62_v63 = vld [vmem:[%s1649_s0 + $0x108] sm:$0xff]  ;;  %v45_v1 = vld [vmem:[%s1649_s0 + $0x80] sm:$0xff] }
  0x28   :  { %v30_v0 = vld [vmem:[%s1649_s0 + $0x8] sm:$0xff]  ;;  %v61_v2 = vld [vmem:[%s1649_s0 + $0x100] sm:$0xff]  ;;  %v79_v5 = vld [vmem:[%s1650_s1 + $0x10] sm:$0xff] }
  0x29   :  { %564 = vperm.xlu0 %1138, %v550_v45   ;;  %569 = vperm.xlu1 %1139, %v551_v46   ;;  %v29_v3 = vld [vmem:[%s1649_s0] sm:$0xff]  ;;  %v78_v4 = vld [vmem:[%s1650_s1 + $0x8] sm:$0xff]  ;;  %v80_v6 = vld [vmem:[%s1650_s1 + $0x18] sm:$0xff] }
  0x2a   :  { %987 = vmatpush3.xpose.msk.msra.mxu0 %vm137_vm0, %v35_v42  ;;  %1071 = vmatpush3.xpose.msk.msra.mxu1 %vm137_vm0, %v67_v39  ;;  %v81_v7 = vld [vmem:[%s1650_s1 + $0x20] sm:$0xff]  ;;  %v82_v8 = vld [vmem:[%s1650_s1 + $0x28] sm:$0xff]  ;;  %v83_v9 = vld [vmem:[%s1650_s1 + $0x30] sm:$0xff] }
  0x2b   :  { %988 = vmatprep.subr.msk.mxu0 %vm137_vm0, %v50_v43  ;;  %1072 = vmatprep.subr.msk.mxu1 %vm137_vm0, %v66_v44  ;;  %v84_v10 = vld [vmem:[%s1650_s1 + $0x38] sm:$0xff]  ;;  %v1527_v11 = vld [vmem:[%s1652_s3] sm:$0xff] }
  0x2d   :  { %777 = vperm.xlu0 %1138, %v771_v50   ;;  %782 = vperm.xlu1 %1139, %v772_v51  }
  0x2e   :  { %989 = vmatpush3.xpose.msk.msra.mxu0 %vm137_vm0, %v34_v47  ;;  %1073 = vmatpush3.xpose.msk.msra.mxu1 %vm137_vm0, %v66_v44 }
  0x2f   :  { %990 = vmatprep.subr.msk.mxu0 %vm137_vm0, %v49_v48  ;;  %1074 = vmatprep.subr.msk.mxu1 %vm137_vm0, %v65_v49 }
  0x31   :  { %787 = vperm.xlu0 %1138, %v773_v55   ;;  %792 = vperm.xlu1 %1139, %v774_v56  }
  0x32   :  { %991 = vmatpush3.xpose.msk.msra.mxu0 %vm137_vm0, %v33_v52  ;;  %1075 = vmatpush3.xpose.msk.msra.mxu1 %vm137_vm0, %v65_v49 }
  0x33   :  { %992 = vmatprep.subr.msk.mxu0 %vm137_vm0, %v48_v53  ;;  %1076 = vmatprep.subr.msk.mxu1 %vm137_vm0, %v64_v54 }
  0x35   :  { %837 = vperm.xlu0 %1138, %v834_v60  }
  0x36   :  { %993 = vmatpush3.xpose.msk.msra.mxu0 %vm137_vm0, %v32_v57  ;;  %1077 = vmatpush3.xpose.msk.msra.mxu1 %vm137_vm0, %v64_v54 }
  0x37   :  { %994 = vmatprep.subr.msk.mxu0 %vm137_vm0, %v47_v58  ;;  %1078 = vmatprep.subr.msk.mxu1 %vm137_vm0, %v63_v59 }
  0x3a   :  { %995 = vmatpush3.xpose.msk.msra.mxu0 %vm137_vm0, %v31_v61  ;;  %1079 = vmatpush3.xpose.msk.msra.mxu1 %vm137_vm0, %v63_v59 }
  0x3b   :  { %996 = vmatprep.subr.msk.mxu0 %vm137_vm0, %v46_v62  ;;  %1080 = vmatprep.subr.msk.mxu1 %vm137_vm0, %v62_v63  ;;  %v86_v62 = vld [vmem:[%s1652_s3 + $0x8] sm:$0xff] }
  0x3e   :  { %997 = vmatpush3.xpose.msk.msra.mxu0 %vm137_vm0, %v30_v0  ;;  %1081 = vmatpush3.xpose.msk.msra.mxu1 %vm137_vm0, %v62_v63 }
  0x3f   :  { %998 = vmatprep.subr.msk.mxu0 %vm137_vm0, %v45_v1  ;;  %1082 = vmatprep.subr.msk.mxu1 %vm137_vm0, %v61_v2 }
  0x42   :  { %999 = vmatpush3.xpose.msk.msra.mxu0 %vm137_vm0, %v29_v3  ;;  %1083 = vmatpush3.xpose.msk.msra.mxu1 %vm137_vm0, %v61_v2 }
  0x45   :  { %1001 = vmatmul.mubr.msk.f32.vlgmr.msra.gmra.mxu0 %vm137_vm0, %v1287_v19  ;;  %1085 = vmatmul.mubr.msk.f32.vlgmr.msra.gmra.mxu1 %vm137_vm0, %v78_v4 }
  0x46   :  { %1002 = vmatprep.mubr.msk.f32.mxu0 %vm137_vm0, %v78_v4  ;;  %1087 = vmatprep.mubr.msk.f32.mxu1 %vm137_vm0, %v79_v5 }
  0x49   :  { %1003 = vmatmul.mubr.msk.f32.gmra.mxu0 %vm137_vm0, %v78_v4  ;;  %1088 = vmatmul.mubr.msk.f32.gmra.mxu1 %vm137_vm0, %v80_v6 }
  0x4a   :  { %1004 = vmatprep.mubr.msk.f32.mxu0 %vm137_vm0, %v79_v5  ;;  %1090 = vmatprep.mubr.msk.f32.mxu1 %vm137_vm0, %v81_v7 }
  0x4d   :  { %1005 = vmatmul.mubr.msk.f32.gmra.mxu0 %vm137_vm0, %v79_v5  ;;  %1091 = vmatmul.mubr.msk.f32.gmra.mxu1 %vm137_vm0, %v82_v8 }
  0x4e   :  { %1006 = vmatprep.mubr.msk.f32.mxu0 %vm137_vm0, %v80_v6  ;;  %1093 = vmatprep.mubr.msk.f32.mxu1 %vm137_vm0, %v83_v9 }
  0x51   :  { %1007 = vmatmul.mubr.msk.f32.gmra.mxu0 %vm137_vm0, %v80_v6  ;;  %1094 = vmatmul.mubr.msk.f32.gmra.mxu1 %vm137_vm0, %v84_v10 }
  0x52   :  { %1008 = vmatprep.mubr.msk.f32.mxu0 %vm137_vm0, %v81_v7  ;;  %649 = vmatprep.mubr.f32.mxu1 %v1169_v12 }
  0x55   :  { %1009 = vmatmul.mubr.msk.f32.gmra.mxu0 %vm137_vm0, %v81_v7 }
  0x56   :  { %1010 = vmatprep.mubr.msk.f32.mxu0 %vm137_vm0, %v82_v8 }
  0x59   :  { %1011 = vmatmul.mubr.msk.f32.gmra.mxu0 %vm137_vm0, %v82_v8 }
  0x5a   :  { %1012 = vmatprep.mubr.msk.f32.mxu0 %vm137_vm0, %v83_v9 }
  0x5d   :  { %1013 = vmatmul.mubr.msk.f32.gmra.mxu0 %vm137_vm0, %v83_v9 }
  0x5e   :  { %1014 = vmatprep.mubr.msk.f32.mxu0 %vm137_vm0, %v84_v10 }
  0x61   :  { %1015 = vmatmul.mubr.msk.f32.gmra.mxu0 %vm137_vm0, %v84_v10 }
  0x62   :  { %1112 = vmatprep.mubr.msk.f32.mxu0 %vm572_vm1, %v1527_v11 }
  0x84   :  { %v1538_v18 = vpop.permute.xlu1 %124 }
  0x88   :  { %v1534_v15 = vpop.permute.xlu0 %134  ;;  %v1546_v26 = vpop.permute.xlu1 %119 }
  0x8c   :  { %v130_v23 = vpop.permute.xlu0 %129 }
  0x98   :  { %v1552_v31 = vpop.permute.xlu0 %114  ;;  %v1559_v39 = vpop.permute.xlu1 %109 }
  0x9c   :  { %v105_v47 = vpop.permute.xlu0 %104  ;;  %v100_v51 = vpop.permute.xlu1 %99 }
 0x105   :  { %v1532_v13 = vpop.f32.mrf.mxu0  ;;  %v1086_v14 = vpop.f32.mrf.mxu1 }
 0x106   :  { %v491_v49 = vadd.f32 %v1086_v14, %v105_v47 }
 0x107   :  { %v1536_v16 = vpop.f32.mrf.mxu0  ;;  %v485_v17 = vpop.f32.mrf.mxu1 }
 0x108   :  { %v486_v53 = vadd.f32 %v485_v17, %v100_v51  ;;  %v1581_v56 = vmax.f32 %v491_v49, 0.0 }
 0x109   :  { %v1540_v19 = vpop.f32.mrf.mxu0  ;;  %v1089_v20 = vpop.f32.mrf.mxu1 }
 0x10a   :  { %v501_v41 = vadd.f32 %v1089_v20, %v1552_v31  ;;  %v1585_v58 = vmax.f32 %v486_v53, 0.0 }
 0x10b   :  { %v1542_v21 = vpop.f32.mrf.mxu0  ;;  %v495_v22 = vpop.f32.mrf.mxu1 }
 0x10c   :  { %v496_v45 = vadd.f32 %v495_v22, %v1559_v39  ;;  %v1573_v50 = vmax.f32 %v501_v41, 0.0 }
 0x10d   :  { %v1544_v24 = vpop.f32.mrf.mxu0  ;;  %v1092_v25 = vpop.f32.mrf.mxu1 }
 0x10e   :  { %v511_v32 = vadd.f32 %v1092_v25, %v1538_v18  ;;  %v1577_v54 = vmax.f32 %v496_v45, 0.0  ;;  %v385_v22 = vadd.f32 %v1544_v24, %v1559_v39  ;;  %v381_v25 = vadd.f32 %v1542_v21, %v105_v47 }
 0x10f   :  { %v1548_v27 = vpop.f32.mrf.mxu0  ;;  %v505_v28 = vpop.f32.mrf.mxu1 }
 0x110   :  { %v506_v36 = vadd.f32 %v505_v28, %v1546_v26  ;;  %v1562_v42 = vmax.f32 %v511_v32, 0.0  ;;  %v379_v28 = vadd.f32 %v1540_v19, %v105_v47  ;;  %v530_v32 = vmax.f32 %v385_v22, 0.0 }
 0x111   :  { %v1550_v29 = vpop.f32.mrf.mxu0  ;;  %v1095_v30 = vpop.f32.mrf.mxu1 }
 0x112   :  { %v521_v33 = vadd.f32 %v1095_v30, %v1534_v15  ;;  %v1569_v46 = vmax.f32 %v506_v36, 0.0  ;;  %v527_v24 = vmax.f32 %v379_v28, 0.0 }
 0x113   :  { %v392_v34 = vpop.f32.mrf.mxu0  ;;  %v515_v35 = vpop.f32.mrf.mxu1 }
 0x114   :  { %v1557_v37 = vmax.f32 %v521_v33, 0.0  ;;  %v516_v38 = vadd.f32 %v515_v35, %v130_v23  ;;  %v393_v10 = vadd.f32 %v392_v34, %v1552_v31  ;;  %v528_v33 = vmax.f32 %v381_v25, 0.0 }
 0x115   :  { %v396_v40 = vpop.f32.mrf.mxu0 }
 0x116   :  { %v1564_v43 = vmax.f32 %v516_v38, 0.0  ;;  %1096 = vmatprep.subr.mxu0 %v1557_v37  ;;  %v397_v8 = vadd.f32 %v396_v40, %v1546_v26 }
 0x117   :  { %v398_v44 = vpop.f32.mrf.mxu0  ;;  %1097 = vmatpush3.msra.mxu0 %v1557_v37 }
 0x118   :  { %1098 = vmatprep.subr.mxu0 %v1564_v43  ;;  %v399_v6 = vadd.f32 %v398_v44, %v1546_v26  ;;  %v534_v26 = vmax.f32 %v393_v10, 0.0 }
 0x119   :  { %v402_v48 = vpop.f32.mrf.mxu0  ;;  %1099 = vmatpush3.msra.mxu0 %v1564_v43 }
 0x11a   :  { %1100 = vmatprep.subr.mxu0 %v1562_v42  ;;  %v403_v4 = vadd.f32 %v402_v48, %v1538_v18  ;;  %v537_v20 = vmax.f32 %v399_v6, 0.0 }
 0x11b   :  { %v404_v52 = vpop.f32.mrf.mxu0  ;;  %1101 = vmatpush3.msra.mxu0 %v1562_v42 }
 0x11c   :  { %1102 = vmatprep.subr.mxu0 %v1569_v46  ;;  %v405_v2 = vadd.f32 %v404_v52, %v1538_v18  ;;  %v539_v17 = vmax.f32 %v403_v4, 0.0  ;;  %v387_v18 = vadd.f32 %v1548_v27, %v1559_v39  ;;  %v373_v27 = vadd.f32 %v1532_v13, %v100_v51  ;;  %v88_v13 = vld [vmem:[%s1652_s3 + $0x18] sm:$0xff] }
 0x11d   :  { %v408_v55 = vpop.f32.mrf.mxu0  ;;  %1103 = vmatpush3.msra.mxu0 %v1569_v46 }
 0x11e   :  { %1104 = vmatprep.subr.mxu0 %v1573_v50  ;;  %v409_v1 = vadd.f32 %v408_v55, %v130_v23  ;;  %v540_v14 = vmax.f32 %v405_v2, 0.0  ;;  %v524_v21 = vmax.f32 %v373_v27, 0.0  ;;  %v840_v27 = vlaneseq }
 0x11f   :  { %v410_v57 = vpop.f32.mrf.mxu0  ;;  %1105 = vmatpush3.msra.mxu0 %v1573_v50 }
 0x120   :  { %1106 = vmatprep.subr.mxu0 %v1577_v54  ;;  %v411_v63 = vadd.f32 %v410_v57, %v130_v23  ;;  %v542_v9 = vmax.f32 %v409_v1, 0.0  ;;  %v536_v23 = vmax.f32 %v397_v8, 0.0  ;;  %vm879_vm2 = vcmp.lt.s32.totalorder %v840_v27, 384 }
 0x121   :  { %v414_v59 = vpop.f32.mrf.mxu0  ;;  %1107 = vmatpush3.msra.mxu0 %v1577_v54 }
 0x122   :  { %1108 = vmatprep.subr.mxu0 %v1581_v56  ;;  %v415_v60 = vadd.f32 %v414_v59, %v1534_v15  ;;  %v543_v7 = vmax.f32 %v411_v63, 0.0 }
 0x123   :  { %v416_v61 = vpop.f32.mrf.mxu0  ;;  %1109 = vmatpush3.msra.mxu0 %v1581_v56 }
 0x124   :  { %v417_v0 = vadd.f32 %v416_v61, %v1534_v15  ;;  %1110 = vmatprep.subr.mxu0 %v1585_v58  ;;  %v545_v5 = vmax.f32 %v415_v60, 0.0  ;;  %v391_v15 = vadd.f32 %v1550_v29, %v1552_v31  ;;  %v375_v29 = vadd.f32 %v1536_v16, %v100_v51  ;;  %v560_v16 = vpop.permute.xlu1 %559 }
 0x125   :  { %1111 = vmatpush3.msra.mxu0 %v1585_v58  ;;  %v531_v31 = vmax.f32 %v387_v18, 0.0 }
 0x126   :  { %v546_v3 = vmax.f32 %v417_v0, 0.0  ;;  %1113 = vmatmul.mubr.msk.f32.vlgmr.msra.gmra.mxu0 %vm572_vm1, %v86_v62  ;;  %v533_v30 = vmax.f32 %v391_v15, 0.0  ;;  %v525_v34 = vmax.f32 %v375_v29, 0.0 }
 0x128   :  { %601 = vmatprep.subr.mxu1 %v546_v3  ;;  %v570_v38 = vpop.permute.xlu1 %569 }
 0x129   :  { %602 = vmatpush1.msra.mxu1 %v545_v5 }
 0x12a   :  { %603 = vmatprep.subr.mxu1 %v543_v7 }
 0x12b   :  { %604 = vmatpush1.msra.mxu1 %v542_v9 }
 0x12c   :  { %605 = vmatprep.subr.mxu1 %v540_v14  ;;  %v783_v52 = vpop.permute.xlu1 %782 }
 0x12d   :  { %606 = vmatpush1.msra.mxu1 %v539_v17 }
 0x12e   :  { %607 = vmatprep.subr.mxu1 %v537_v20 }
 0x12f   :  { %608 = vmatpush1.msra.mxu1 %v536_v23 }
 0x130   :  { %609 = vmatprep.subr.mxu1 %v534_v26  ;;  %v793_v10 = vpop.permute.xlu1 %792 }
 0x131   :  { %610 = vmatpush1.msra.mxu1 %v533_v30 }
 0x132   :  { %611 = vmatprep.subr.mxu1 %v531_v31 }
 0x133   :  { %612 = vmatpush1.msra.mxu1 %v530_v32 }
 0x134   :  { %613 = vmatprep.subr.mxu1 %v528_v33 }
 0x135   :  { %614 = vmatpush1.msra.mxu1 %v527_v24 }
 0x136   :  { %615 = vmatprep.subr.mxu1 %v525_v34 }
 0x137   :  { %616 = vmatpush1.msra.mxu1 %v524_v21 }
 0x138   :  { %960 = vmatmul.mubr.msk.f32.vlgmr.msra.gmra.mxu1 %vm572_vm1, %v1527_v11  ;;  %1118 = vmatprep.subr.mxu1 %v1557_v37  ;;  %v87_v11 = vld [vmem:[%s1652_s3 + $0x10] sm:$0xff]  ;;  %s1171_s3 = smov [#allocation3]  }
 0x139   :  { %1126 = vmatpush3.msra.mxu1 %v1557_v37  ;;  %655 = vmatprep.mubr.f32.mxu1 %v1169_v12  ;;  %s888_s4 = sshll.u32 %s1171_s3, 4  ;;  %s889_s4 = int_to_ptr.vmem [resolvable:$true] %s888_s4 }
 0x13a   :  { %1119 = vmatprep.subr.mxu1 %v1564_v43  ;;  %s1146_s25 = scalar_lea.vmem %s889_s4, 48  ;;  %s1150_s26 = scalar_lea.vmem %s889_s4, 64 }
 0x13b   :  { %1127 = vmatpush3.msra.mxu1 %v1564_v43  ;;  %p1147_p0 = scmp.ne.s32.totalorder %s889_s4, %s1146_s25  ;;  %p1151_p1 = scmp.lt.s32.totalorder %s889_s4, %s889_s4 }
 0x13c   :  { %961 = vmatmul.mubr.msk.f32.gmra.mxu1 %vm572_vm1, %v86_v62  ;;  %1120 = vmatprep.subr.mxu1 %v1562_v42  ;;  %p1152_p2 = scmp.lt.s32.totalorder %s1150_s26, %s1146_s25 }
 0x13d   :  { %1128 = vmatpush3.msra.mxu1 %v1562_v42  ;;  %661 = vmatprep.mubr.f32.mxu1 %v1169_v12 }
 0x13e   :  { %1121 = vmatprep.subr.mxu1 %v1569_v46  ;;  %p1153_p3 = por %p1152_p2, %p1151_p1 }
 0x13f   :  { %1129 = vmatpush3.msra.mxu1 %v1569_v46 }
 0x140   :  { %962 = vmatmul.mubr.msk.f32.gmra.mxu1 %vm572_vm1, %v87_v11  ;;  %1122 = vmatprep.subr.mxu1 %v1573_v50  ;;  %p1154_p4 = pnand %p1153_p3, %p1147_p0 }
 0x141   :  { %1130 = vmatpush3.msra.mxu1 %v1573_v50  ;;  %667 = vmatprep.mubr.f32.mxu1 %v1169_v12  ;;  %v555_v12 = vpop.permute.xlu0 %554 }
 0x142   :  { %1123 = vmatprep.subr.mxu1 %v1577_v54 }
 0x143   :  { %1131 = vmatpush3.msra.mxu1 %v1577_v54 }
 0x144   :  { %963 = vmatmul.mubr.msk.f32.gmra.mxu1 %vm572_vm1, %v88_v13  ;;  %1124 = vmatprep.subr.mxu1 %v1581_v56 }
 0x145   :  { %1132 = vmatpush3.msra.mxu1 %v1581_v56  ;;  %1115 = vmatprep.mubr.msk.f32.mxu1 %vm572_vm1, %v87_v11  ;;  %v565_v19 = vpop.permute.xlu0 %564 }
 0x146   :  { %1125 = vmatprep.subr.mxu1 %v1585_v58 }
 0x147   :  { %1133 = vmatpush3.msra.mxu1 %v1585_v58 }
 0x148   :  { %1116 = vmatmul.mubr.msk.f32.vlgmr.msra.gmra.mxu1 %vm572_vm1, %v88_v13 }
 0x149   :  { %v778_v42 = vpop.permute.xlu0 %777 }
 0x14d   :  { %v788_v59 = vpop.permute.xlu0 %787 }
 0x1e6   :  { %v1114_v37 = vpop.f32.mrf.mxu0 }
 0x1e7   :  { %v746_v60 = vadd.f32 %v1114_v37, %v560_v16 }
 0x1e8   :  { %v740_v45 = vpop.f32.mrf.mxu0 }
 0x1e9   :  { %v741_v53 = vadd.f32 %v740_v45, %v555_v12  ;;  %v764_v14 = vmax.f32 %v746_v60, 0.0 }
 0x1eb   :  { %v761_v3 = vmax.f32 %v741_v53, 0.0  ;;  %v800_v32 = vmul.f32 %v783_v52, %v764_v14 }
 0x1ed   :  { %v797_v25 = vmul.f32 %v778_v42, %v761_v3 }
 0x1ef   :  { %v825_v11 = vadd.f32 %v800_v32, %v797_v25 }
 0x1f8   :  { %v651_v35 = vpop.f32.mrf.mxu1 }
 0x1f9   :  { %v652_v40 = vadd.f32 %v651_v35, %v555_v12  ;;  %v841_v35 = vshrl.u32 %v840_v27, 7 }
 0x1fa   :  { %v653_v36 = vpop.f32.mrf.mxu1 }
 0x1fb   :  { %v654_v43 = vadd.f32 %v653_v36, %v555_v12  ;;  %v759_v49 = vmax.f32 %v652_v40, 0.0 }
 0x1fc   :  { %v657_v39 = vpop.f32.mrf.mxu1 }
 0x1fd   :  { %v658_v41 = vadd.f32 %v657_v39, %v560_v16  ;;  %v760_v54 = vmax.f32 %v654_v43, 0.0  ;;  %v795_v63 = vmul.f32 %v778_v42, %v759_v49  ;;  %v842_v43 = vsub.s32 0, %v841_v35 }
 0x1fe   :  { %v659_v44 = vpop.f32.mrf.mxu1 }
 0x1ff   :  { %v762_v46 = vmax.f32 %v658_v41, 0.0  ;;  %v660_v47 = vadd.f32 %v659_v44, %v560_v16  ;;  %v796_v4 = vmul.f32 %v778_v42, %v760_v54 }
 0x200   :  { %v663_v48 = vpop.f32.mrf.mxu1 }
 0x201   :  { %v763_v50 = vmax.f32 %v660_v47, 0.0  ;;  %v664_v51 = vadd.f32 %v663_v48, %v565_v19  ;;  %v798_v56 = vmul.f32 %v783_v52, %v762_v46  ;;  %v838_v46 = vpop.permute.xlu0 %837 }
 0x202   :  { %v665_v55 = vpop.f32.mrf.mxu1 }
 0x203   :  { %v765_v57 = vmax.f32 %v664_v51, 0.0  ;;  %v666_v58 = vadd.f32 %v665_v55, %v565_v19  ;;  %v799_v61 = vmul.f32 %v783_v52, %v763_v50  ;;  %v807_v6 = vadd.f32 %v798_v56, %v795_v63 }
 0x204   :  { %v669_v62 = vpop.f32.mrf.mxu1  ;;  %v843_v50 = vrot.slane %v838_v46, %v842_v43 }
 0x205   :  { %v801_v0 = vmul.f32 %v788_v59, %v765_v57  ;;  %v766_v1 = vmax.f32 %v666_v58, 0.0  ;;  %v670_v2 = vadd.f32 %v669_v62, %v570_v38  ;;  %v816_v15 = vadd.f32 %v799_v61, %v796_v4 }
 0x206   :  { %v671_v5 = vpop.f32.mrf.mxu1 }
 0x207   :  { %v802_v7 = vmul.f32 %v788_v59, %v766_v1  ;;  %v768_v8 = vmax.f32 %v670_v2, 0.0  ;;  %v672_v9 = vadd.f32 %v671_v5, %v570_v38  ;;  %v808_v18 = vadd.f32 %v807_v6, %v801_v0 }
 0x208   :  { %v1117_v17 = vpop.f32.mrf.mxu1 }
 0x209   :  { %v804_v20 = vmul.f32 %v793_v10, %v768_v8  ;;  %v769_v22 = vmax.f32 %v672_v9, 0.0  ;;  %v756_v23 = vadd.f32 %v1117_v17, %v570_v38  ;;  %v817_v28 = vadd.f32 %v816_v15, %v802_v7 }
 0x20a   :  { %v750_v26 = vpop.f32.mrf.mxu1 }
 0x20b   :  { %v809_v30 = vadd.f32 %v808_v18, %v804_v20  ;;  %v805_v29 = vmul.f32 %v793_v10, %v769_v22  ;;  %v751_v31 = vadd.f32 %v750_v26, %v565_v19  ;;  %v770_v34 = vmax.f32 %v756_v23, 0.0 }
 0x20d   :  { %v810_v33 = vrot.slane %v809_v30, 4  ;;  %v818_v24 = vadd.f32 %v817_v28, %v805_v29  ;;  %v767_v21 = vmax.f32 %v751_v31, 0.0  ;;  %v806_v38 = vmul.f32 %v793_v10, %v770_v34 }
 0x20f   :  { %v811_v13 = vadd.f32 %v810_v33, %v809_v30  ;;  %v819_v12 = vrot.slane %v818_v24, 4  ;;  %v803_v16 = vmul.f32 %v788_v59, %v767_v21  ;;  %v1170_v59 = vmov 1966171168  }
 0x210   :  { %v855_v60 = vunpack.c.l.s4 %v1170_v59 }
 0x211   :  { %v812_v36 = vrot.slane %v811_v13, 2  ;;  %v820_v37 = vadd.f32 %v819_v12, %v818_v24  ;;  %v826_v39 = vadd.f32 %v825_v11, %v803_v16 }
 0x212   :  { %v856_v61 = vunpack.c.0.s8 %v855_v60 }
 0x213   :  { %v813_v40 = vadd.f32 %v812_v36, %v811_v13  ;;  %v821_v41 = vrot.slane %v820_v37, 2  ;;  %v827_v42 = vadd.f32 %v826_v39, %v806_v38 }
 0x214   :  { %v859_v0 = vsub.s32 %v856_v61, %v841_v35 }
 0x215   :  { %v814_v19 = vrot.slane %v813_v40, 1  ;;  %v822_v44 = vadd.f32 %v821_v41, %v820_v37  ;;  %v828_v45 = vrot.slane %v827_v42, 4 }
 0x217   :  { %v815_v47 = vadd.f32 %v814_v19, %v813_v40  ;;  %v823_v48 = vrot.slane %v822_v44, 1  ;;  %v829_v49 = vadd.f32 %v828_v45, %v827_v42 }
 0x219   :  { %v824_v51 = vadd.f32 %v823_v48, %v822_v44  ;;  %v830_v52 = vrot.slane %v829_v49, 2  ;;  %v844_v53 = vadd.f32 %v843_v50, %v815_v47 }
 0x21b   :  { %v845_v54 = vadd.f32 %v843_v50, %v824_v51  ;;  %v831_v55 = vadd.f32 %v830_v52, %v829_v49 }
 0x21d   :  { %1140 = vtanh.f32 %v845_v54  ;;  %v832_v56 = vrot.slane %v831_v55, 1 }
 0x21e   :  { %1142 = vtanh.f32 %v844_v53 }
 0x21f   :  { %v833_v57 = vadd.f32 %v832_v56, %v831_v55 }
 0x221   :  { %v846_v58 = vadd.f32 %v843_v50, %v833_v57 }
 0x223   :  { %1144 = vtanh.f32 %v846_v58 }
 0x22a   :  { %v1141_v62 = vpop.eup %1140 }
 0x22b   :  { %v1143_v63 = vpop.eup %1142 }
 0x22c   :  { %v853_v1 = vcombine.low %v1143_v63, %v1141_v62 }
 0x22e   :  { %v860_v3 = vrot.slane %v853_v1, %v859_v0 }
 0x230   :  { %v1145_v2 = vpop.eup %1144 }
 0x231   :  { %v867_v4 = vrot.slane %v1145_v2, %v859_v0 }
 0x233   :  { %v868_v5 = vcombine.low %v860_v3, %v867_v4 }
 0x235   :  { %v875_v6 = vrot.slane %v868_v5, %v859_v0 }
 0x237   :  { %881 = vst.msk [vmem:[#allocation3] sm:$0x7] %vm879_vm2, %v875_v6 }
 0x238   :  { %1157 = shalt.err (!%p1154_p4)
}
 0x239   :  { %891 = dma.vmem_to_hbm [thread:$0]  %s889_s4, 48, %s1656_s7, [#allocation4]  }
 0x23a   :  { %1166 = dma.done.wait [#allocation4], 48  }
 0x23b   :  { %1167 = vsyncadd [#allocation4], 4294967248 }
 0x23c   :  { %895 = vsyncpa [#allocation4], 1 }

</bundles_post_ra>
